<compile_context>
chip_gen: v5e
topology: v5e:2x2
jax: 0.10.0
libtpu: 0.0.40
codegen_flags: <defaults>
</compile_context>

<pallas_src>
import math
import functools

import jax
import jax.numpy as jnp
from jax.experimental import pallas as pl
from jax.experimental.pallas import tpu as pltpu


_VMEM_LIMIT_BYTES = 48 * 1024 * 1024   # safe on v5e/v6e (128 MiB VMEM) and v7x (64 MiB)
_NEG_INF = -1e18                       # finite mask fill, matches the PyTorch module


def _pick_tile(dim, candidates):
    """Largest candidate tile that evenly divides `dim`, else the full dim."""
    for c in candidates:
        if dim >= c and dim % c == 0:
            return c
    return dim


def _mosaic_params(dimension_semantics):
    return pltpu.CompilerParams(
        dimension_semantics=dimension_semantics,
        vmem_limit_bytes=_VMEM_LIMIT_BYTES,
    )


# ------------------------------ linear kernel -------------------------------

def _linear_kernel(x_ref, w_ref, b_ref, o_ref, acc_ref, *, compute_dtype):
    k = pl.program_id(2)

    @pl.when(k == 0)
    def _():
        acc_ref[...] = jnp.zeros_like(acc_ref)

    acc_ref[...] += jnp.dot(
        x_ref[...].astype(compute_dtype),
        w_ref[...].astype(compute_dtype),
        preferred_element_type=jnp.float32,
    )

    @pl.when(k == pl.num_programs(2) - 1)
    def _():
        o_ref[...] = (acc_ref[...] + b_ref[...]).astype(o_ref.dtype)


def linear(x, w, b, *, compute_dtype=jnp.bfloat16):
    """Tiled x @ w + b on the MXU. x: (M, K), w: (K, N), b: (N,) -> (M, N) f32."""
    M, K = x.shape
    N = w.shape[1]
    tm = _pick_tile(M, (256, 128))
    tn = _pick_tile(N, (256, 128))
    tk = _pick_tile(K, (512, 256, 128))
    grid = (M // tm, N // tn, K // tk)
    kernel = functools.partial(_linear_kernel, compute_dtype=compute_dtype)
    return pl.pallas_call(
        kernel,
        out_shape=jax.ShapeDtypeStruct((M, N), jnp.float32),
        grid=grid,
        in_specs=[
            pl.BlockSpec((tm, tk), lambda i, j, k: (i, k)),
            pl.BlockSpec((tk, tn), lambda i, j, k: (k, j)),
            pl.BlockSpec((1, tn), lambda i, j, k: (0, j)),
        ],
        out_specs=pl.BlockSpec((tm, tn), lambda i, j, k: (i, j)),
        scratch_shapes=[pltpu.VMEM((tm, tn), jnp.float32)],
        compiler_params=_mosaic_params(("parallel", "parallel", "arbitrary")),
    )(x, w, b.reshape(1, N))


# -------------------------- fused Q/K/V projection ---------------------------

def _qkv_proj_kernel(x_ref, wq_ref, wk_ref, wv_ref, bq_ref, bk_ref, bv_ref,
                     q_ref, k_ref, v_ref, accq_ref, acck_ref, accv_ref,
                     *, compute_dtype):
    kstep = pl.program_id(2)

    @pl.when(kstep == 0)
    def _():
        accq_ref[...] = jnp.zeros_like(accq_ref)
        acck_ref[...] = jnp.zeros_like(acck_ref)
        accv_ref[...] = jnp.zeros_like(accv_ref)

    x = x_ref[...].astype(compute_dtype)   # activation tile read once, used 3x
    accq_ref[...] += jnp.dot(x, wq_ref[...].astype(compute_dtype),
                             preferred_element_type=jnp.float32)
    acck_ref[...] += jnp.dot(x, wk_ref[...].astype(compute_dtype),
                             preferred_element_type=jnp.float32)
    accv_ref[...] += jnp.dot(x, wv_ref[...].astype(compute_dtype),
                             preferred_element_type=jnp.float32)

    @pl.when(kstep == pl.num_programs(2) - 1)
    def _():
        q_ref[...] = (accq_ref[...] + bq_ref[...]).astype(q_ref.dtype)
        k_ref[...] = (acck_ref[...] + bk_ref[...]).astype(k_ref.dtype)
        v_ref[...] = (accv_ref[...] + bv_ref[...]).astype(v_ref.dtype)


def fused_qkv_projection(x, wq, wk, wv, bq, bk, bv, *, compute_dtype=jnp.bfloat16):
    M, K = x.shape
    N = wq.shape[1]
    tm = _pick_tile(M, (256, 128))
    tn = _pick_tile(N, (256, 128))
    tk = _pick_tile(K, (512, 256, 128))
    grid = (M // tm, N // tn, K // tk)
    kernel = functools.partial(_qkv_proj_kernel, compute_dtype=compute_dtype)
    w_spec = pl.BlockSpec((tk, tn), lambda i, j, k: (k, j))
    b_spec = pl.BlockSpec((1, tn), lambda i, j, k: (0, j))
    o_spec = pl.BlockSpec((tm, tn), lambda i, j, k: (i, j))
    o_sds = jax.ShapeDtypeStruct((M, N), jnp.float32)
    return pl.pallas_call(
        kernel,
        out_shape=(o_sds, o_sds, o_sds),
        grid=grid,
        in_specs=[
            pl.BlockSpec((tm, tk), lambda i, j, k: (i, k)),
            w_spec, w_spec, w_spec,
            b_spec, b_spec, b_spec,
        ],
        out_specs=(o_spec, o_spec, o_spec),
        scratch_shapes=[
            pltpu.VMEM((tm, tn), jnp.float32),
            pltpu.VMEM((tm, tn), jnp.float32),
            pltpu.VMEM((tm, tn), jnp.float32),
        ],
        compiler_params=_mosaic_params(("parallel", "parallel", "arbitrary")),
    )(x, wq, wk, wv, bq.reshape(1, N), bk.reshape(1, N), bv.reshape(1, N))


# --------------------------- flash attention kernel --------------------------

def _make_flash_kernel(dim_per_head, compute_dtype, has_mask):
    scale = 1.0 / math.sqrt(dim_per_head)

    def kernel(q_ref, k_ref, v_ref, *rest):
        if has_mask:
            mask_ref, o_ref, m_sc, l_sc, acc_sc = rest
        else:
            o_ref, m_sc, l_sc, acc_sc = rest
            mask_ref = None

        ki = pl.program_id(2)

        @pl.when(ki == 0)
        def _():
            m_sc[...] = jnp.full(m_sc.shape, -jnp.inf, m_sc.dtype)
            l_sc[...] = jnp.zeros_like(l_sc)
            acc_sc[...] = jnp.zeros_like(acc_sc)

        # q/k/v blocks: (H, tile, Dh).  Scale q in f32, matmul in compute_dtype.
        q = (q_ref[0].astype(jnp.float32) * scale).astype(compute_dtype)
        k = k_ref[0].astype(compute_dtype)
        v = v_ref[0].astype(compute_dtype)

        # (H, tq, tk) scores — contraction over Dh, batched over heads (no k.T).
        s = jnp.einsum("hqd,hkd->hqk", q, k, preferred_element_type=jnp.float32)

        if mask_ref is not None:
            s = jnp.where(mask_ref[0][None, :, :] > 0, _NEG_INF, s)

        m_prev = m_sc[...]                                       # (H, tq, 1)
        m_new = jnp.maximum(m_prev, jnp.max(s, axis=-1, keepdims=True))
        alpha = jnp.exp(m_prev - m_new)
        p = jnp.exp(s - m_new)                                   # (H, tq, tk) f32
        l_sc[...] = alpha * l_sc[...] + jnp.sum(p, axis=-1, keepdims=True)
        acc_sc[...] = alpha * acc_sc[...] + jnp.einsum(
            "hqk,hkd->hqd", p.astype(compute_dtype), v,
            preferred_element_type=jnp.float32)
        m_sc[...] = m_new

        @pl.when(ki == pl.num_programs(2) - 1)
        def _():
            o_ref[0] = (acc_sc[...] * pl.reciprocal(l_sc[...], approx=True)
                        ).astype(o_ref.dtype)

    return kernel


def flash_attention(q, k, v, mask=None, *, compute_dtype=jnp.bfloat16,
                    kv_block_size=None):
    """q: (B,H,Lq,Dh), k/v: (B,H,Lk,Dh), mask: (B,Lq,Lk) nonzero==masked.
    Returns context (B,H,Lq,Dh) in float32."""
    B, H, Lq, Dh = q.shape
    Lk = k.shape[2]
    tq = _pick_tile(Lq, (128,))
    if kv_block_size is None:
        tk = _pick_tile(Lk, (256, 128))
    else:
        assert Lk % kv_block_size == 0
        tk = kv_block_size
    grid = (B, Lq // tq, Lk // tk)

    kernel = _make_flash_kernel(Dh, compute_dtype, has_mask=mask is not None)

    in_specs = [
        pl.BlockSpec((1, H, tq, Dh), lambda b, qi, ki: (b, 0, qi, 0)),
        pl.BlockSpec((1, H, tk, Dh), lambda b, qi, ki: (b, 0, ki, 0)),
        pl.BlockSpec((1, H, tk, Dh), lambda b, qi, ki: (b, 0, ki, 0)),
    ]
    args = [q, k, v]
    if mask is not None:
        in_specs.append(pl.BlockSpec((1, tq, tk), lambda b, qi, ki: (b, qi, ki)))
        args.append(mask)

    return pl.pallas_call(
        kernel,
        out_shape=jax.ShapeDtypeStruct((B, H, Lq, Dh), jnp.float32),
        grid=grid,
        in_specs=in_specs,
        out_specs=pl.BlockSpec((1, H, tq, Dh), lambda b, qi, ki: (b, 0, qi, 0)),
        scratch_shapes=[
            pltpu.VMEM((H, tq, 1), jnp.float32),
            pltpu.VMEM((H, tq, 1), jnp.float32),
            pltpu.VMEM((H, tq, Dh), jnp.float32),
        ],
        compiler_params=_mosaic_params(("parallel", "parallel", "arbitrary")),
    )(*args)


# --------------------- head-0 attention probabilities ------------------------

def _make_top_attn_kernel(dim_per_head, compute_dtype, has_mask):
    scale = 1.0 / math.sqrt(dim_per_head)

    def kernel(q_ref, k_ref, *rest):
        if has_mask:
            mask_ref, o_ref = rest
        else:
            (o_ref,) = rest
            mask_ref = None

        q = (q_ref[0].astype(jnp.float32) * scale).astype(compute_dtype)  # (tq, Dh)
        k = k_ref[0].astype(compute_dtype)                                # (Lk, Dh)
        s = jax.lax.dot_general(q, k, (((1,), (1,)), ((), ())),
                                preferred_element_type=jnp.float32)       # (tq, Lk)
        if mask_ref is not None:
            s = jnp.where(mask_ref[0] > 0, _NEG_INF, s)
        s_max = jnp.max(s, axis=-1, keepdims=True)
        e = jnp.exp(s - s_max)
        o_ref[0] = (e / jnp.sum(e, axis=-1, keepdims=True)).astype(o_ref.dtype)

    return kernel


def top_head_attention(q0, k0, mask=None, *, compute_dtype=jnp.bfloat16):
    """Softmax probabilities for head 0 only.  q0: (B,Lq,Dh), k0: (B,Lk,Dh)."""
    B, Lq, Dh = q0.shape
    Lk = k0.shape[1]
    tq = _pick_tile(Lq, (256, 128))
    grid = (B, Lq // tq)
    kernel = _make_top_attn_kernel(Dh, compute_dtype, has_mask=mask is not None)
    in_specs = [
        pl.BlockSpec((1, tq, Dh), lambda b, qi: (b, qi, 0)),
        pl.BlockSpec((1, Lk, Dh), lambda b, qi: (b, 0, 0)),
    ]
    args = [q0, k0]
    if mask is not None:
        in_specs.append(pl.BlockSpec((1, tq, Lk), lambda b, qi: (b, qi, 0)))
        args.append(mask)
    return pl.pallas_call(
        kernel,
        out_shape=jax.ShapeDtypeStruct((B, Lq, Lk), jnp.float32),
        grid=grid,
        in_specs=in_specs,
        out_specs=pl.BlockSpec((1, tq, Lk), lambda b, qi: (b, qi, 0)),
        compiler_params=_mosaic_params(("parallel", "parallel")),
    )(*args)


# ------------------------------ module wrapper -------------------------------

def init_params(key, model_dim, head_count, dim_per_head=None):
    if dim_per_head is None:
        assert model_dim % head_count == 0
        dim_per_head = model_dim // head_count
    inner = head_count * dim_per_head
    ks = jax.random.split(key, 8)
    s_in = 1.0 / math.sqrt(model_dim)
    s_out = 1.0 / math.sqrt(inner)
    return {
        "head_count": head_count,
        "dim_per_head": dim_per_head,
        "model_dim": model_dim,
        # weights stored as [in, out] so kernels do x @ W + b
        "wk": jax.random.uniform(ks[0], (model_dim, inner), jnp.float32, -s_in, s_in),
        "bk": jax.random.uniform(ks[1], (inner,), jnp.float32, -s_in, s_in),
        "wv": jax.random.uniform(ks[2], (model_dim, inner), jnp.float32, -s_in, s_in),
        "bv": jax.random.uniform(ks[3], (inner,), jnp.float32, -s_in, s_in),
        "wq": jax.random.uniform(ks[4], (model_dim, inner), jnp.float32, -s_in, s_in),
        "bq": jax.random.uniform(ks[5], (inner,), jnp.float32, -s_in, s_in),
        "wo": jax.random.uniform(ks[6], (inner, model_dim), jnp.float32, -s_out, s_out),
        "bo": jax.random.uniform(ks[7], (model_dim,), jnp.float32, -s_out, s_out),
    }


def multi_headed_attention(params, key, value, query, mask=None, *,
                           compute_dtype=jnp.bfloat16, kv_block_size=None):
    B, Lk, D = key.shape
    Lq = query.shape[1]
    H = params["head_count"]
    Dh = params["dim_per_head"]
    HD = H * Dh

    if key is value and value is query:
        # Self-attention fast path: one fused projection kernel streams the
        # activation from HBM once for all of Q/K/V.
        q_flat, k_flat, v_flat = fused_qkv_projection(
            query.reshape(B * Lq, D),
            params["wq"], params["wk"], params["wv"],
            params["bq"], params["bk"], params["bv"],
            compute_dtype=compute_dtype)
    else:
        k_flat = linear(key.reshape(B * Lk, D), params["wk"], params["bk"],
                        compute_dtype=compute_dtype)
        v_flat = linear(value.reshape(B * Lk, D), params["wv"], params["bv"],
                        compute_dtype=compute_dtype)
        q_flat = linear(query.reshape(B * Lq, D), params["wq"], params["bq"],
                        compute_dtype=compute_dtype)

    # split heads -> [B, H, L, Dh]  (k/v in this layout are also the returned cache)
    # TODO(synk): head split/combine transposes are still XLA ops; fusing them into
    # the kernels needs non-leading-batch dot_general / in-kernel relayout support.
    q_up = q_flat.reshape(B, Lq, H, Dh).transpose(0, 2, 1, 3)
    key_up = k_flat.reshape(B, Lk, H, Dh).transpose(0, 2, 1, 3)
    value_up = v_flat.reshape(B, Lk, H, Dh).transpose(0, 2, 1, 3)

    # mask: nonzero => masked out; carried as bf16 to halve its DMA footprint.
    mask_b = None if mask is None else mask.astype(jnp.bfloat16)

    ctx = flash_attention(q_up, key_up, value_up, mask_b,
                          compute_dtype=compute_dtype,
                          kv_block_size=kv_block_size)            # (B, H, Lq, Dh)

    # Attention probabilities for head 0 only (the module's `top_attn` return);
    # the full (B, H, Lq, Lk) probability tensor is never materialized in HBM.
    top_attn = top_head_attention(q_up[:, 0], key_up[:, 0], mask_b,
                                  compute_dtype=compute_dtype)    # (B, Lq, Lk)

    # TODO(synk): dropout(p=0.1) on the attention weights omitted (eval semantics).

    context = ctx.transpose(0, 2, 1, 3).reshape(B * Lq, HD)
    output = linear(context, params["wo"], params["bo"],
                    compute_dtype=compute_dtype).reshape(B, Lq, D)

    # TODO(synk): enc_attn_cache / self_attn_cache (incremental decoding) not
    # implemented; key_up/value_up are returned so callers can build the cache.
    return output, top_attn, [key_up, value_up]


# ----------------------------- pure-JAX reference ----------------------------

def _reference(params, key, value, query, mask=None):
    B, Lk, D = key.shape
    Lq = query.shape[1]
    H = params["head_count"]
    Dh = params["dim_per_head"]

    def lin(x, w, b):
        return x @ w + b

    def split(x, L):
        return x.reshape(B, L, H, Dh).transpose(0, 2, 1, 3)

    k_up = split(lin(key, params["wk"], params["bk"]), Lk)
    v_up = split(lin(value, params["wv"], params["bv"]), Lk)
    q_up = split(lin(query, params["wq"], params["bq"]), Lq) / math.sqrt(Dh)
    scores = jnp.einsum("bhqd,bhkd->bhqk", q_up, k_up)
    if mask is not None:
        scores = jnp.where(mask[:, None, :, :], -1e18, scores)
    attn = jax.nn.softmax(scores, axis=-1)
    ctx = jnp.einsum("bhqk,bhkd->bhqd", attn, v_up)
    ctx = ctx.transpose(0, 2, 1, 3).reshape(B, Lq, H * Dh)
    out = ctx @ params["wo"] + params["bo"]
    return out, attn[:, 0], [k_up, v_up]


def _check(name, got, want, atol, rtol):
    got = jnp.asarray(got, jnp.float32)
    want = jnp.asarray(want, jnp.float32)
    if not bool(jnp.allclose(got, want, atol=atol, rtol=rtol)):
        err = float(jnp.max(jnp.abs(got - want)))
        raise AssertionError(
            f"{name}: mismatch (max abs err {err:.3e}, atol={atol}, rtol={rtol})")


# ----------------------------------- main ------------------------------------

if __name__ == "__main__":
    model_dim, head_count = 32, 4
    B = 2

    root = jax.random.PRNGKey(0)
    kp, ka, kk, kv_, kq, km1, km2 = jax.random.split(root, 7)
    params = init_params(kp, model_dim, head_count)

    # (a) self-attention (fused QKV path), no mask, f32, multi-step KV tiling.
    La = 16
    x = jax.random.normal(ka, (B, La, model_dim), jnp.float32)
    out_a, top_a, (kup_a, vup_a) = multi_headed_attention(
        params, x, x, x, mask=None, compute_dtype=jnp.float32, kv_block_size=8)
    jax.block_until_ready((out_a, top_a, kup_a, vup_a))
    r_out, r_top, (r_k, r_v) = _reference(params, x, x, x, None)
    assert out_a.shape == (B, La, model_dim)
    assert top_a.shape == (B, La, La)
    assert kup_a.shape == (B, head_count, La, model_dim // head_count)
    _check("self-attn/f32 output", out_a, r_out, 2e-2, 2e-2)
    _check("self-attn/f32 top_attn", top_a, r_top, 1e-4, 1e-4)
    _check("self-attn/f32 key_up", kup_a, r_k, 1e-4, 1e-4)
    _check("self-attn/f32 value_up", vup_a, r_v, 1e-4, 1e-4)

    # (b) cross-attention (separate projections), rectangular Lq != Lk, masked, f32.
    Lq, Lk = 8, 16
    key_in = jax.random.normal(kk, (B, Lk, model_dim), jnp.float32)
    val_in = jax.random.normal(kv_, (B, Lk, model_dim), jnp.float32)
    qry_in = jax.random.normal(kq, (B, Lq, model_dim), jnp.float32)
    mask_xb = jax.random.bernoulli(km1, 0.25, (B, Lq, Lk))
    out_b, top_b, (kup_b, vup_b) = multi_headed_attention(
        params, key_in, val_in, qry_in, mask=mask_xb, compute_dtype=jnp.float32)
    jax.block_until_ready((out_b, top_b, kup_b, vup_b))
    r_out, r_top, (r_k, r_v) = _reference(params, key_in, val_in, qry_in, mask_xb)
    _check("cross-attn/f32 output", out_b, r_out, 2e-2, 2e-2)
    _check("cross-attn/f32 top_attn", top_b, r_top, 1e-4, 1e-4)
    _check("cross-attn/f32 key_up", kup_b, r_k, 1e-4, 1e-4)
    _check("cross-attn/f32 value_up", vup_b, r_v, 1e-4, 1e-4)

    # (c) self-attention, masked, bf16 matmul operands (f32 accumulation).
    Lc = 8
    xc = jax.random.normal(kq, (B, Lc, model_dim), jnp.float32)
    mask_c = jax.random.bernoulli(km2, 0.25, (B, Lc, Lc))
    out_c, top_c, (kup_c, vup_c) = multi_headed_attention(
        params, xc, xc, xc, mask=mask_c, compute_dtype=jnp.bfloat16)
    jax.block_until_ready((out_c, top_c, kup_c, vup_c))
    r_out, r_top, (r_k, r_v) = _reference(params, xc, xc, xc, mask_c)
    _check("self-attn/bf16 output", out_c, r_out, 1.5e-1, 1.5e-1)
    _check("self-attn/bf16 top_attn", top_c, r_top, 5e-2, 5e-2)
    _check("self-attn/bf16 key_up", kup_c, r_k, 1.5e-1, 1.5e-1)
    _check("self-attn/bf16 value_up", vup_c, r_v, 1.5e-1, 1.5e-1)

    print("KERNEL_OK")
</pallas_src>

<mosaic_0001>
module attributes {stable_mosaic.version = 11 : i64} {
  func.func @_qkv_proj_kernel(%arg0: i32, %arg1: i32, %arg2: i32, %arg3: memref<32x32xf32, #tpu.memory_space<vmem>>, %arg4: memref<32x32xf32, #tpu.memory_space<vmem>>, %arg5: memref<32x32xf32, #tpu.memory_space<vmem>>, %arg6: memref<32x32xf32, #tpu.memory_space<vmem>>, %arg7: memref<1x32xf32, #tpu.memory_space<vmem>>, %arg8: memref<1x32xf32, #tpu.memory_space<vmem>>, %arg9: memref<1x32xf32, #tpu.memory_space<vmem>>, %arg10: memref<32x32xf32, #tpu.memory_space<vmem>>, %arg11: memref<32x32xf32, #tpu.memory_space<vmem>>, %arg12: memref<32x32xf32, #tpu.memory_space<vmem>>, %arg13: memref<32x32xf32, #tpu.memory_space<vmem>>, %arg14: memref<32x32xf32, #tpu.memory_space<vmem>>, %arg15: memref<32x32xf32, #tpu.memory_space<vmem>>) attributes {dimension_semantics = [#tpu.dimension_semantics<parallel>, #tpu.dimension_semantics<parallel>, #tpu.dimension_semantics<arbitrary>], iteration_bounds = array<i64: 1, 1, 1>, scalar_prefetch = 0 : i64, scratch_operands = 3 : i64, tpu.core_type = #tpu.core_type<tc>, window_params = [{transform_indices = @transform_0, window_bounds = array<i64: 32, 32>}, {transform_indices = @transform_1, window_bounds = array<i64: 32, 32>}, {transform_indices = @transform_2, window_bounds = array<i64: 32, 32>}, {transform_indices = @transform_3, window_bounds = array<i64: 32, 32>}, {transform_indices = @transform_4, window_bounds = array<i64: 1, 32>}, {transform_indices = @transform_5, window_bounds = array<i64: 1, 32>}, {transform_indices = @transform_6, window_bounds = array<i64: 1, 32>}, {transform_indices = @transform_7, window_bounds = array<i64: 32, 32>}, {transform_indices = @transform_8, window_bounds = array<i64: 32, 32>}, {transform_indices = @transform_9, window_bounds = array<i64: 32, 32>}]} {
    %c0_i32 = arith.constant 0 : i32
    %0 = arith.cmpi eq, %arg2, %c0_i32 : i32
    %1 = arith.extui %0 : i1 to i32
    %c0_i32_0 = arith.constant 0 : i32
    %2 = arith.cmpi ne, %1, %c0_i32_0 : i32
    scf.if %2 {
      %cst_24 = arith.constant 0.000000e+00 : f32
      %22 = vector.broadcast %cst_24 : f32 to vector<32x32xf32>
      %c0_25 = arith.constant 0 : index
      %c0_26 = arith.constant 0 : index
      %23 = vector.load %arg13[%c0_25, %c0_26] : memref<32x32xf32, #tpu.memory_space<vmem>>, vector<32x32xf32>
      tpu.vector_store %arg13[%c0_25, %c0_26], %22 {strides = array<i32>} : memref<32x32xf32, #tpu.memory_space<vmem>>, vector<32x32xf32>,
      %cst_27 = arith.constant 0.000000e+00 : f32
      %24 = vector.broadcast %cst_27 : f32 to vector<32x32xf32>
      %c0_28 = arith.constant 0 : index
      %c0_29 = arith.constant 0 : index
      %25 = vector.load %arg14[%c0_28, %c0_29] : memref<32x32xf32, #tpu.memory_space<vmem>>, vector<32x32xf32>
      tpu.vector_store %arg14[%c0_28, %c0_29], %24 {strides = array<i32>} : memref<32x32xf32, #tpu.memory_space<vmem>>, vector<32x32xf32>,
      %cst_30 = arith.constant 0.000000e+00 : f32
      %26 = vector.broadcast %cst_30 : f32 to vector<32x32xf32>
      %c0_31 = arith.constant 0 : index
      %c0_32 = arith.constant 0 : index
      %27 = vector.load %arg15[%c0_31, %c0_32] : memref<32x32xf32, #tpu.memory_space<vmem>>, vector<32x32xf32>
      tpu.vector_store %arg15[%c0_31, %c0_32], %26 {strides = array<i32>} : memref<32x32xf32, #tpu.memory_space<vmem>>, vector<32x32xf32>,
    } else {
    }
    %c0 = arith.constant 0 : index
    %c0_1 = arith.constant 0 : index
    %3 = vector.load %arg3[%c0, %c0_1] : memref<32x32xf32, #tpu.memory_space<vmem>>, vector<32x32xf32>
    %c0_2 = arith.constant 0 : index
    %c0_3 = arith.constant 0 : index
    %4 = vector.load %arg13[%c0_2, %c0_3] : memref<32x32xf32, #tpu.memory_space<vmem>>, vector<32x32xf32>
    %c0_4 = arith.constant 0 : index
    %c0_5 = arith.constant 0 : index
    %5 = vector.load %arg4[%c0_4, %c0_5] : memref<32x32xf32, #tpu.memory_space<vmem>>, vector<32x32xf32>
    %cst = arith.constant dense<0.000000e+00> : vector<32x32xf32>
    %6 = tpu.matmul %3, %5, %cst {dimension_numbers = #tpu.dot_dimension_numbers<[1], [0], [0], [1], [0, 0, 1, 1], [], []>} : vector<32x32xf32>, vector<32x32xf32>, vector<32x32xf32> -> vector<32x32xf32>
    %7 = arith.addf %4, %6 : vector<32x32xf32>
    %c0_6 = arith.constant 0 : index
    %c0_7 = arith.constant 0 : index
    %8 = vector.load %arg13[%c0_6, %c0_7] : memref<32x32xf32, #tpu.memory_space<vmem>>, vector<32x32xf32>
    tpu.vector_store %arg13[%c0_6, %c0_7], %7 {strides = array<i32>} : memref<32x32xf32, #tpu.memory_space<vmem>>, vector<32x32xf32>,
    %c0_8 = arith.constant 0 : index
    %c0_9 = arith.constant 0 : index
    %9 = vector.load %arg14[%c0_8, %c0_9] : memref<32x32xf32, #tpu.memory_space<vmem>>, vector<32x32xf32>
    %c0_10 = arith.constant 0 : index
    %c0_11 = arith.constant 0 : index
    %10 = vector.load %arg5[%c0_10, %c0_11] : memref<32x32xf32, #tpu.memory_space<vmem>>, vector<32x32xf32>
    %cst_12 = arith.constant dense<0.000000e+00> : vector<32x32xf32>
    %11 = tpu.matmul %3, %10, %cst_12 {dimension_numbers = #tpu.dot_dimension_numbers<[1], [0], [0], [1], [0, 0, 1, 1], [], []>} : vector<32x32xf32>, vector<32x32xf32>, vector<32x32xf32> -> vector<32x32xf32>
    %12 = arith.addf %9, %11 : vector<32x32xf32>
    %c0_13 = arith.constant 0 : index
    %c0_14 = arith.constant 0 : index
    %13 = vector.load %arg14[%c0_13, %c0_14] : memref<32x32xf32, #tpu.memory_space<vmem>>, vector<32x32xf32>
    tpu.vector_store %arg14[%c0_13, %c0_14], %12 {strides = array<i32>} : memref<32x32xf32, #tpu.memory_space<vmem>>, vector<32x32xf32>,
    %c0_15 = arith.constant 0 : index
    %c0_16 = arith.constant 0 : index
    %14 = vector.load %arg15[%c0_15, %c0_16] : memref<32x32xf32, #tpu.memory_space<vmem>>, vector<32x32xf32>
    %c0_17 = arith.constant 0 : index
    %c0_18 = arith.constant 0 : index
    %15 = vector.load %arg6[%c0_17, %c0_18] : memref<32x32xf32, #tpu.memory_space<vmem>>, vector<32x32xf32>
    %cst_19 = arith.constant dense<0.000000e+00> : vector<32x32xf32>
    %16 = tpu.matmul %3, %15, %cst_19 {dimension_numbers = #tpu.dot_dimension_numbers<[1], [0], [0], [1], [0, 0, 1, 1], [], []>} : vector<32x32xf32>, vector<32x32xf32>, vector<32x32xf32> -> vector<32x32xf32>
    %17 = arith.addf %14, %16 : vector<32x32xf32>
    %c0_20 = arith.constant 0 : index
    %c0_21 = arith.constant 0 : index
    %18 = vector.load %arg15[%c0_20, %c0_21] : memref<32x32xf32, #tpu.memory_space<vmem>>, vector<32x32xf32>
    tpu.vector_store %arg15[%c0_20, %c0_21], %17 {strides = array<i32>} : memref<32x32xf32, #tpu.memory_space<vmem>>, vector<32x32xf32>,
    %c0_i32_22 = arith.constant 0 : i32
    %19 = arith.cmpi eq, %arg2, %c0_i32_22 : i32
    %20 = arith.extui %19 : i1 to i32
    %c0_i32_23 = arith.constant 0 : i32
    %21 = arith.cmpi ne, %20, %c0_i32_23 : i32
    scf.if %21 {
      %c0_24 = arith.constant 0 : index
      %c0_25 = arith.constant 0 : index
      %22 = vector.load %arg13[%c0_24, %c0_25] : memref<32x32xf32, #tpu.memory_space<vmem>>, vector<32x32xf32>
      %c0_26 = arith.constant 0 : index
      %c0_27 = arith.constant 0 : index
      %23 = vector.load %arg7[%c0_26, %c0_27] : memref<1x32xf32, #tpu.memory_space<vmem>>, vector<1x32xf32>
      %24 = vector.broadcast %23 : vector<1x32xf32> to vector<32x32xf32>
      %25 = arith.addf %22, %24 : vector<32x32xf32>
      %c0_28 = arith.constant 0 : index
      %c0_29 = arith.constant 0 : index
      %26 = vector.load %arg10[%c0_28, %c0_29] : memref<32x32xf32, #tpu.memory_space<vmem>>, vector<32x32xf32>
      tpu.vector_store %arg10[%c0_28, %c0_29], %25 {strides = array<i32>} : memref<32x32xf32, #tpu.memory_space<vmem>>, vector<32x32xf32>,
      %c0_30 = arith.constant 0 : index
      %c0_31 = arith.constant 0 : index
      %27 = vector.load %arg14[%c0_30, %c0_31] : memref<32x32xf32, #tpu.memory_space<vmem>>, vector<32x32xf32>
      %c0_32 = arith.constant 0 : index
      %c0_33 = arith.constant 0 : index
      %28 = vector.load %arg8[%c0_32, %c0_33] : memref<1x32xf32, #tpu.memory_space<vmem>>, vector<1x32xf32>
      %29 = vector.broadcast %28 : vector<1x32xf32> to vector<32x32xf32>
      %30 = arith.addf %27, %29 : vector<32x32xf32>
      %c0_34 = arith.constant 0 : index
      %c0_35 = arith.constant 0 : index
      %31 = vector.load %arg11[%c0_34, %c0_35] : memref<32x32xf32, #tpu.memory_space<vmem>>, vector<32x32xf32>
      tpu.vector_store %arg11[%c0_34, %c0_35], %30 {strides = array<i32>} : memref<32x32xf32, #tpu.memory_space<vmem>>, vector<32x32xf32>,
      %c0_36 = arith.constant 0 : index
      %c0_37 = arith.constant 0 : index
      %32 = vector.load %arg15[%c0_36, %c0_37] : memref<32x32xf32, #tpu.memory_space<vmem>>, vector<32x32xf32>
      %c0_38 = arith.constant 0 : index
      %c0_39 = arith.constant 0 : index
      %33 = vector.load %arg9[%c0_38, %c0_39] : memref<1x32xf32, #tpu.memory_space<vmem>>, vector<1x32xf32>
      %34 = vector.broadcast %33 : vector<1x32xf32> to vector<32x32xf32>
      %35 = arith.addf %32, %34 : vector<32x32xf32>
      %c0_40 = arith.constant 0 : index
      %c0_41 = arith.constant 0 : index
      %36 = vector.load %arg12[%c0_40, %c0_41] : memref<32x32xf32, #tpu.memory_space<vmem>>, vector<32x32xf32>
      tpu.vector_store %arg12[%c0_40, %c0_41], %35 {strides = array<i32>} : memref<32x32xf32, #tpu.memory_space<vmem>>, vector<32x32xf32>,
    } else {
    }
    return
  }
  func.func @transform_0(%arg0: i32, %arg1: i32, %arg2: i32) -> (i32, i32) {
    %c0_i32 = arith.constant 0 : i32
    return %arg0, %arg2 : i32, i32
  }
  func.func @transform_1(%arg0: i32, %arg1: i32, %arg2: i32) -> (i32, i32) {
    %c0_i32 = arith.constant 0 : i32
    return %arg2, %arg1 : i32, i32
  }
  func.func @transform_2(%arg0: i32, %arg1: i32, %arg2: i32) -> (i32, i32) {
    %c0_i32 = arith.constant 0 : i32
    return %arg2, %arg1 : i32, i32
  }
  func.func @transform_3(%arg0: i32, %arg1: i32, %arg2: i32) -> (i32, i32) {
    %c0_i32 = arith.constant 0 : i32
    return %arg2, %arg1 : i32, i32
  }
  func.func @transform_4(%arg0: i32, %arg1: i32, %arg2: i32) -> (i32, i32) {
    %c0_i32 = arith.constant 0 : i32
    %c0_i32_0 = arith.constant 0 : i32
    return %c0_i32, %arg1 : i32, i32
  }
  func.func @transform_5(%arg0: i32, %arg1: i32, %arg2: i32) -> (i32, i32) {
    %c0_i32 = arith.constant 0 : i32
    %c0_i32_0 = arith.constant 0 : i32
    return %c0_i32, %arg1 : i32, i32
  }
  func.func @transform_6(%arg0: i32, %arg1: i32, %arg2: i32) -> (i32, i32) {
    %c0_i32 = arith.constant 0 : i32
    %c0_i32_0 = arith.constant 0 : i32
    return %c0_i32, %arg1 : i32, i32
  }
  func.func @transform_7(%arg0: i32, %arg1: i32, %arg2: i32) -> (i32, i32) {
    %c0_i32 = arith.constant 0 : i32
    return %arg0, %arg1 : i32, i32
  }
  func.func @transform_8(%arg0: i32, %arg1: i32, %arg2: i32) -> (i32, i32) {
    %c0_i32 = arith.constant 0 : i32
    return %arg0, %arg1 : i32, i32
  }
  func.func @transform_9(%arg0: i32, %arg1: i32, %arg2: i32) -> (i32, i32) {
    %c0_i32 = arith.constant 0 : i32
    return %arg0, %arg1 : i32, i32
  }
}

</mosaic_0001>

<bundles_post_ra>
// kernel: tpu_custom_call.1
= control target key start
LH: loop header
LB: loop body
LE: loop exit
PB: predicated region body
PF: predicated region fallthrough
CT: control target
= control target key end

     0   :  { %15 = vsyncpa [#allocation6], 0  ;;  %s765_s0 = inlined_call_operand.hbm [shape: f32[32,32], index: 0, kind: input, shape index: {}]   ;;  %s766_s1 = inlined_call_operand.hbm [shape: f32[32,32], index: 1, kind: input, shape index: {}]   ;;  %s767_s2 = inlined_call_operand.hbm [shape: f32[32,32], index: 2, kind: input, shape index: {}]   ;;  %s768_s3 = inlined_call_operand.hbm [shape: f32[32,32], index: 3, kind: input, shape index: {}]   ;;  %s769_s4 = inlined_call_operand.vmem [shape: f32[1,32], index: 4, kind: input, shape index: {}]   ;;  %s770_s5 = inlined_call_operand.vmem [shape: f32[1,32], index: 5, kind: input, shape index: {}]   ;;  %s771_s6 = inlined_call_operand.vmem [shape: f32[1,32], index: 6, kind: input, shape index: {}]   ;;  %s772_s7 = inlined_call_operand.hbm [shape: f32[32,32], index: 7, kind: output, shape index: {0}]   ;;  %s773_s8 = inlined_call_operand.hbm [shape: f32[32,32], index: 8, kind: output, shape index: {1}]   ;;  %s774_s9 = inlined_call_operand.hbm [shape: f32[32,32], index: 9, kind: output, shape index: {2}]  }
   0x1   :  { %16 = vsyncpa [#allocation9], 0 }
   0x2   :  { %17 = vsyncpa [#allocation12], 0 }
   0x3   :  { %18 = vsyncpa [#allocation7], 0 }
   0x4   :  { %19 = vsyncpa [#allocation15], 0  ;;  %s37_s11 = sshll.u32 %s766_s1, 4  ;;  %s585_s12 = smov [#allocation8]   ;;  %s38_s11 = int_to_ptr.hbm [resolvable:$true] %s37_s11 }
   0x5   :  { %s39_s13 = sshll.u32 %s585_s12, 4  ;;  %s24_s16 = sshll.u32 %s765_s0, 4  ;;  %s40_s13 = int_to_ptr.vmem [resolvable:$true] %s39_s13  ;;  %s25_s16 = int_to_ptr.hbm [resolvable:$true] %s24_s16 }
   0x6   :  { %s586_s17 = smov 128   ;;  %s587_s18 = smov 8  }
   0x7   :  { %45 = dma.hbm_to_vmem [thread:$0]  %s38_s11, 512, %s40_s13, [#allocation9], %s586_s17, %s586_s17, %s587_s18  }
   0x8   :  { %s588_s19 = smov [#allocation5]   ;;  %s50_s1 = sshll.u32 %s767_s2, 4  ;;  %s51_s1 = int_to_ptr.hbm [resolvable:$true] %s50_s1 }
   0x9   :  { %s26_s20 = sshll.u32 %s588_s19, 4  ;;  %s63_s24 = sshll.u32 %s768_s3, 4  ;;  %s27_s20 = int_to_ptr.vmem [resolvable:$true] %s26_s20  ;;  %s64_s24 = int_to_ptr.hbm [resolvable:$true] %s63_s24 }
   0xa   :  { %32 = dma.hbm_to_vmem [thread:$0]  %s25_s16, 512, %s27_s20, [#allocation6], %s586_s17, %s586_s17, %s587_s18  }
   0xb   :  { %s589_s25 = smov [#allocation10]   ;;  %s590_s27 = smov [#allocation11]  }
   0xc   :  { %s52_s26 = sshll.u32 %s589_s25, 4  ;;  %s65_s2 = sshll.u32 %s590_s27, 4  ;;  %s53_s26 = int_to_ptr.vmem [resolvable:$true] %s52_s26  ;;  %s66_s2 = int_to_ptr.vmem [resolvable:$true] %s65_s2 }
   0xd   :  { %58 = dma.hbm_to_vmem [thread:$0]  %s51_s1, 512, %s53_s26, [#allocation9], %s586_s17, %s586_s17, %s587_s18  }
   0xe   :  { %71 = dma.hbm_to_vmem [thread:$0]  %s64_s24, 512, %s66_s2, [#allocation12], %s586_s17, %s586_s17, %s587_s18  }
   0xf   :  { %575 = dma.done.wait [#allocation6], 512  }
  0x10   :  { %576 = vsyncadd [#allocation6], 4294966784 }
  0x11   :  { %577 = dma.done.wait [#allocation9], 1024  }
  0x12   :  { %578 = vsyncadd [#allocation9], 4294966272 }
  0x13   :  { %579 = dma.done.wait [#allocation12], 512  }
  0x14   :  { %580 = vsyncadd [#allocation12], 4294966784  ;;  %vm98_vm0 = vcmask 261120   ;;  %v591_v0 = vmov 0.0   ;;  %v122_v1 = vld [vmem:[#allocation8 + $0x18] sm:$0xff]  ;;  %v121_v3 = vld [vmem:[#allocation8 + $0x10] sm:$0xff] }
  0x15   :  { %104 = vst.msk [vmem:[#allocation3 + $0x8] sm:$0xff] %vm98_vm0, %v591_v0  ;;  %v225_v2 = vld [vmem:[#allocation11 + $0x18] sm:$0xff]  ;;  %382 = vmatpush.msra.mxu3 %v122_v1  ;;  %v224_v4 = vld [vmem:[#allocation11 + $0x10] sm:$0xff]  ;;  %v120_v5 = vld [vmem:[#allocation8 + $0x8] sm:$0xff]  ;;  %148 = vmatpush.msra.mxu0 %v122_v1  ;;  %s333_s13 = sshll.u32 %s773_s8, 4  ;;  %s593_s14 = smov [#allocation13]   ;;  %s334_s13 = int_to_ptr.hbm [resolvable:$true] %s333_s13 }
  0x16   :  { %99 = vst.msk [vmem:[#allocation2] sm:$0xff] %vm98_vm0, %v591_v0  ;;  %390 = vmatpush.msra.mxu2 %v225_v2  ;;  %v223_v6 = vld [vmem:[#allocation11 + $0x8] sm:$0xff]  ;;  %v180_v7 = vld [vmem:[#allocation10 + $0x18] sm:$0xff]  ;;  %v179_v8 = vld [vmem:[#allocation10 + $0x10] sm:$0xff]  ;;  %s318_s15 = sshll.u32 %s593_s14, 4  ;;  %s320_s20 = sshll.u32 %s772_s7, 4  ;;  %s319_s15 = int_to_ptr.vmem [resolvable:$true] %s318_s15  ;;  %s321_s20 = int_to_ptr.hbm [resolvable:$true] %s320_s20 }
  0x17   :  { %100 = vst.msk [vmem:[#allocation2 + $0x8] sm:$0xff] %vm98_vm0, %v591_v0  ;;  %383 = vmatpush.msra.mxu3 %v121_v3  ;;  %386 = vmatpush.msra.mxu1 %v180_v7  ;;  %v119_v9 = vld [vmem:[#allocation8] sm:$0xff]  ;;  %v112_v11 = vld [vmem:[#allocation5 + $0x8] sm:$0xff]  ;;  %v113_v15 = vld [vmem:[#allocation5 + $0x10] sm:$0xff]  ;;  %s594_s21 = smov [#allocation16]   ;;  %s346_s8 = sshll.u32 %s774_s9, 4  ;;  %s347_s8 = int_to_ptr.hbm [resolvable:$true] %s346_s8 }
  0x18   :  { %101 = vst.msk [vmem:[#allocation2 + $0x10] sm:$0xff] %vm98_vm0, %v591_v0  ;;  %391 = vmatpush.msra.mxu2 %v224_v4  ;;  %v222_v10 = vld [vmem:[#allocation11] sm:$0xff]  ;;  %149 = vmatpush.msra.mxu0 %v121_v3  ;;  %v178_v12 = vld [vmem:[#allocation10 + $0x8] sm:$0xff]  ;;  %v114_v16 = vld [vmem:[#allocation5 + $0x18] sm:$0xff]  ;;  %s344_s22 = sshll.u32 %s594_s21, 4  ;;  %s345_s22 = int_to_ptr.vmem [resolvable:$true] %s344_s22 }
  0x19   :  { %102 = vst.msk [vmem:[#allocation2 + $0x18] sm:$0xff] %vm98_vm0, %v591_v0  ;;  %384 = vmatpush.msra.mxu3 %v120_v5  ;;  %387 = vmatpush.msra.mxu1 %v179_v8  ;;  %v111_v13 = vld [vmem:[#allocation5] sm:$0xff] }
  0x1a   :  { %103 = vst.msk [vmem:[#allocation3] sm:$0xff] %vm98_vm0, %v591_v0  ;;  %392 = vmatpush.msra.mxu2 %v223_v6  ;;  %150 = vmatpush.msra.mxu0 %v120_v5  ;;  %v177_v14 = vld [vmem:[#allocation10] sm:$0xff] }
  0x1b   :  { %105 = vst.msk [vmem:[#allocation3 + $0x10] sm:$0xff] %vm98_vm0, %v591_v0  ;;  %385 = vmatpush.msra.mxu3 %v119_v9  ;;  %388 = vmatpush.msra.mxu1 %v178_v12  ;;  %v699_v30 = vld [vmem:[%s769_s4] ss:$0 sm:$0xff] }
  0x1c   :  { %106 = vst.msk [vmem:[#allocation3 + $0x18] sm:$0xff] %vm98_vm0, %v591_v0  ;;  %393 = vmatpush.msra.mxu2 %v222_v10  ;;  %371 = vmatmul.msk.f32.vlgmr.msra.gmra.mxu3 %vm98_vm0, %v112_v11  ;;  %v174_v18 = vld [vmem:[#allocation3 + $0x8] sm:$0xff]  ;;  %v705_v34 = vld [vmem:[%s770_s5] ss:$0 sm:$0xff]  ;;  %s592_s5 = smov [#allocation14]  }
  0x1d   :  { %107 = vst.msk [vmem:[#allocation4] sm:$0xff] %vm98_vm0, %v591_v0  ;;  %379 = vmatmul.msk.f32.vlgmr.msra.gmra.mxu2 %vm98_vm0, %v112_v11  ;;  %151 = vmatpush.msra.mxu0 %v119_v9  ;;  %v115_v17 = vld [vmem:[#allocation2] sm:$0xff] }
  0x1e   :  { %108 = vst.msk [vmem:[#allocation4 + $0x8] sm:$0xff] %vm98_vm0, %v591_v0  ;;  %370 = vmatmul.msk.f32.vlgmr.msra.gmra.mxu0 %vm98_vm0, %v111_v13  ;;  %389 = vmatpush.msra.mxu1 %v177_v14  ;;  %v116_v22 = vld [vmem:[#allocation2 + $0x8] sm:$0xff]  ;;  %v712_v44 = vld [vmem:[%s771_s6] ss:$0 sm:$0xff]  ;;  %s734_s6 = sshll.u32 %s592_s5, 4  ;;  %s332_s6 = int_to_ptr.vmem [resolvable:$true] %s734_s6 }
  0x1f   :  { %109 = vst.msk [vmem:[#allocation4 + $0x10] sm:$0xff] %vm98_vm0, %v591_v0  ;;  %193 = vmatpush.msrb.mxu0 %v180_v7  ;;  %375 = vmatmul.msk.f32.vlgmr.msra.gmra.mxu1 %vm98_vm0, %v112_v11  ;;  %v117_v36 = vld [vmem:[#allocation2 + $0x10] sm:$0xff] }
  0x20   :  { %110 = vst.msk [vmem:[#allocation4 + $0x18] sm:$0xff] %vm98_vm0, %v591_v0  ;;  %v118_v57 = vld [vmem:[#allocation2 + $0x18] sm:$0xff] }
  0x21   :  { %194 = vmatpush.msrb.mxu0 %v179_v8  ;;  %v173_v29 = vld [vmem:[#allocation3] sm:$0xff] }
  0x22   :  { %v175_v31 = vld [vmem:[#allocation3 + $0x10] sm:$0xff] }
  0x23   :  { %195 = vmatpush.msrb.mxu0 %v178_v12  ;;  %v176_v52 = vld [vmem:[#allocation3 + $0x18] sm:$0xff] }
  0x24   :  { %372 = vmatmul.msk.f32.gmra.mxu3 %vm98_vm0, %v113_v15  ;;  %v218_v48 = vld [vmem:[#allocation4] sm:$0xff] }
  0x25   :  { %380 = vmatmul.msk.f32.gmra.mxu2 %vm98_vm0, %v113_v15  ;;  %196 = vmatpush.msrb.mxu0 %v177_v14  ;;  %v219_v23 = vld [vmem:[#allocation4 + $0x8] sm:$0xff] }
  0x26   :  { %374 = vmatmul.msk.f32.vlgmr.msrb.gmra.mxu0 %vm98_vm0, %v111_v13  ;;  %v220_v37 = vld [vmem:[#allocation4 + $0x10] sm:$0xff] }
  0x27   :  { %238 = vmatpush.msra.mxu0 %v225_v2  ;;  %376 = vmatmul.msk.f32.gmra.mxu1 %vm98_vm0, %v113_v15  ;;  %v221_v58 = vld [vmem:[#allocation4 + $0x18] sm:$0xff] }
  0x29   :  { %239 = vmatpush.msra.mxu0 %v224_v4 }
  0x2b   :  { %240 = vmatpush.msra.mxu0 %v223_v6 }
  0x2c   :  { %373 = vmatmul.msk.f32.gmra.mxu3 %vm98_vm0, %v114_v16 }
  0x2d   :  { %381 = vmatmul.msk.f32.gmra.mxu2 %vm98_vm0, %v114_v16  ;;  %241 = vmatpush.msra.mxu0 %v222_v10 }
  0x2e   :  { %378 = vmatmul.msk.f32.vlgmr.msra.gmra.mxu0 %vm98_vm0, %v111_v13 }
  0x2f   :  { %377 = vmatmul.msk.f32.gmra.mxu1 %vm98_vm0, %v114_v16 }
  0x9b   :  { %v153_v19 = vpop.f32.mrf.mxu0 }
  0x9c   :  { %v165_v20 = vadd.f32 %v153_v19, %v115_v17  ;;  %v201_v21 = vpop.f32.mrf.mxu1 }
  0x9d   :  { %v211_v24 = vadd.f32 %v201_v21, %v174_v18 }
  0x9e   :  { %169 = vst.msk [vmem:[#allocation2] sm:$0xff] %vm98_vm0, %v165_v20 }
  0x9f   :  { %v156_v25 = vpop.f32.mrf.mxu3  ;;  %215 = vst.msk [vmem:[#allocation3 + $0x8] sm:$0xff] %vm98_vm0, %v211_v24 }
  0xa0   :  { %v246_v26 = vpop.f32.mrf.mxu2  ;;  %v166_v27 = vadd.f32 %v156_v25, %v116_v22 }
  0xa1   :  { %v256_v28 = vadd.f32 %v246_v26, %v219_v23 }
  0xa2   :  { %170 = vst.msk [vmem:[#allocation2 + $0x8] sm:$0xff] %vm98_vm0, %v166_v27 }
  0xa3   :  { %260 = vst.msk [vmem:[#allocation4 + $0x8] sm:$0xff] %vm98_vm0, %v256_v28  ;;  %v198_v32 = vpop.f32.mrf.mxu0 }
  0xa4   :  { %v210_v33 = vadd.f32 %v198_v32, %v173_v29  ;;  %v204_v35 = vpop.f32.mrf.mxu1 }
  0xa5   :  { %v266_v38 = vld [vmem:[#allocation2] sm:$0xff]  ;;  %v212_v39 = vadd.f32 %v204_v35, %v175_v31 }
  0xa6   :  { %214 = vst.msk [vmem:[#allocation3] sm:$0xff] %vm98_vm0, %v210_v33  ;;  %v274_v40 = vadd.f32 %v699_v30, %v266_v38  ;;  %v283_v43 = vld [vmem:[#allocation3 + $0x8] sm:$0xff] }
  0xa7   :  { %v159_v41 = vpop.f32.mrf.mxu3  ;;  %216 = vst.msk [vmem:[#allocation3 + $0x10] sm:$0xff] %vm98_vm0, %v212_v39  ;;  %v291_v47 = vadd.f32 %v705_v34, %v283_v43 }
  0xa8   :  { %v249_v42 = vpop.f32.mrf.mxu2  ;;  %v167_v45 = vadd.f32 %v159_v41, %v117_v36  ;;  %278 = vst.msk [vmem:[#allocation13] sm:$0xff] %vm98_vm0, %v274_v40 }
  0xa9   :  { %v257_v46 = vadd.f32 %v249_v42, %v220_v37  ;;  %v267_v49 = vld [vmem:[#allocation2 + $0x8] sm:$0xff]  ;;  %295 = vst.msk [vmem:[#allocation14 + $0x8] sm:$0xff] %vm98_vm0, %v291_v47 }
  0xaa   :  { %171 = vst.msk [vmem:[#allocation2 + $0x10] sm:$0xff] %vm98_vm0, %v167_v45  ;;  %v275_v50 = vadd.f32 %v699_v30, %v267_v49  ;;  %v299_v51 = vld [vmem:[#allocation4 + $0x8] sm:$0xff] }
  0xab   :  { %261 = vst.msk [vmem:[#allocation4 + $0x10] sm:$0xff] %vm98_vm0, %v257_v46  ;;  %v243_v53 = vpop.f32.mrf.mxu0  ;;  %v307_v54 = vadd.f32 %v712_v44, %v299_v51 }
  0xac   :  { %v255_v55 = vadd.f32 %v243_v53, %v218_v48  ;;  %v207_v56 = vpop.f32.mrf.mxu1  ;;  %279 = vst.msk [vmem:[#allocation13 + $0x8] sm:$0xff] %vm98_vm0, %v275_v50 }
  0xad   :  { %v282_v59 = vld [vmem:[#allocation3] sm:$0xff]  ;;  %v213_v60 = vadd.f32 %v207_v56, %v176_v52  ;;  %311 = vst.msk [vmem:[#allocation16 + $0x8] sm:$0xff] %vm98_vm0, %v307_v54 }
  0xae   :  { %259 = vst.msk [vmem:[#allocation4] sm:$0xff] %vm98_vm0, %v255_v55  ;;  %v290_v61 = vadd.f32 %v705_v34, %v282_v59  ;;  %v284_v0 = vld [vmem:[#allocation3 + $0x10] sm:$0xff] }
  0xaf   :  { %v162_v62 = vpop.f32.mrf.mxu3  ;;  %217 = vst.msk [vmem:[#allocation3 + $0x18] sm:$0xff] %vm98_vm0, %v213_v60  ;;  %v292_v3 = vadd.f32 %v705_v34, %v284_v0 }
  0xb0   :  { %v252_v63 = vpop.f32.mrf.mxu2  ;;  %v168_v1 = vadd.f32 %v162_v62, %v118_v57  ;;  %294 = vst.msk [vmem:[#allocation14] sm:$0xff] %vm98_vm0, %v290_v61 }
  0xb1   :  { %v258_v2 = vadd.f32 %v252_v63, %v221_v58  ;;  %v268_v4 = vld [vmem:[#allocation2 + $0x10] sm:$0xff]  ;;  %296 = vst.msk [vmem:[#allocation14 + $0x10] sm:$0xff] %vm98_vm0, %v292_v3 }
  0xb2   :  { %172 = vst.msk [vmem:[#allocation2 + $0x18] sm:$0xff] %vm98_vm0, %v168_v1  ;;  %v276_v5 = vadd.f32 %v699_v30, %v268_v4  ;;  %v300_v6 = vld [vmem:[#allocation4 + $0x10] sm:$0xff] }
  0xb3   :  { %262 = vst.msk [vmem:[#allocation4 + $0x18] sm:$0xff] %vm98_vm0, %v258_v2  ;;  %v308_v7 = vadd.f32 %v712_v44, %v300_v6 }
  0xb4   :  { %280 = vst.msk [vmem:[#allocation13 + $0x10] sm:$0xff] %vm98_vm0, %v276_v5 }
  0xb5   :  { %v298_v8 = vld [vmem:[#allocation4] sm:$0xff]  ;;  %312 = vst.msk [vmem:[#allocation16 + $0x10] sm:$0xff] %vm98_vm0, %v308_v7 }
  0xb6   :  { %v306_v9 = vadd.f32 %v712_v44, %v298_v8  ;;  %v285_v10 = vld [vmem:[#allocation3 + $0x18] sm:$0xff] }
  0xb7   :  { %v293_v11 = vadd.f32 %v705_v34, %v285_v10 }
  0xb8   :  { %310 = vst.msk [vmem:[#allocation16] sm:$0xff] %vm98_vm0, %v306_v9 }
  0xb9   :  { %v269_v12 = vld [vmem:[#allocation2 + $0x18] sm:$0xff]  ;;  %297 = vst.msk [vmem:[#allocation14 + $0x18] sm:$0xff] %vm98_vm0, %v293_v11 }
  0xba   :  { %v277_v13 = vadd.f32 %v699_v30, %v269_v12  ;;  %v301_v14 = vld [vmem:[#allocation4 + $0x18] sm:$0xff]  ;;  %339 = dma.vmem_to_hbm [thread:$0]  %s332_s6, 512, %s334_s13, [#allocation15], %s586_s17, %s586_s17, %s587_s18  }
  0xbb   :  { %v309_v15 = vadd.f32 %v712_v44, %v301_v14 }
  0xbc   :  { %281 = vst.msk [vmem:[#allocation13 + $0x18] sm:$0xff] %vm98_vm0, %v277_v13 }
  0xbd   :  { %326 = dma.vmem_to_hbm [thread:$0]  %s319_s15, 512, %s321_s20, [#allocation7], %s586_s17, %s586_s17, %s587_s18   ;;  %313 = vst.msk [vmem:[#allocation16 + $0x18] sm:$0xff] %vm98_vm0, %v309_v15 }
  0xbe   :  { %352 = dma.vmem_to_hbm [thread:$0]  %s345_s22, 512, %s347_s8, [#allocation15], %s586_s17, %s586_s17, %s587_s18  }
  0xbf   :  { %581 = dma.done.wait [#allocation7], 512  }
  0xc0   :  { %582 = vsyncadd [#allocation7], 4294966784 }
  0xc1   :  { %583 = dma.done.wait [#allocation15], 1024  }
  0xc2   :  { %584 = vsyncadd [#allocation15], 4294966272 }
  0xc3   :  { %365 = vsyncpa [#allocation6], 1 }
  0xc4   :  { %366 = vsyncpa [#allocation9], 1 }
  0xc5   :  { %367 = vsyncpa [#allocation12], 1 }
  0xc6   :  { %368 = vsyncpa [#allocation7], 1 }
  0xc7   :  { %369 = vsyncpa [#allocation15], 1 }

</bundles_post_ra>
